<compile_context>
chip_gen: v7x
topology: tpu7x:2x2x1
jax: 0.10.0
libtpu: 0.0.40
codegen_flags: <defaults>
</compile_context>

<pallas_src>
import functools

import jax
import jax.numpy as jnp
from jax.experimental import pallas as pl
from jax.experimental.pallas import tpu as pltpu

LANE = 128     # vreg lane width (last dim)


def _round_up(v: int, m: int) -> int:
    return -(-v // m) * m


# ----------------------------------------------------------------------------
# Kernel: fused  x -> L1 -> ReLU -> L2 -> ReLU -> ... -> Ln  (no ReLU on last)
# ----------------------------------------------------------------------------
def _fused_mlp_kernel(x_ref, *refs):
    # refs = (w1, b1, w2, b2, ..., wn, bn, o_ref)
    o_ref = refs[-1]
    wb = refs[:-1]
    n_layers = len(wb) // 2

    h = x_ref[...]                                   # already compute dtype
    for li in range(n_layers):
        w_ref = wb[2 * li]                           # (in, out_pad) compute dtype
        b_ref = wb[2 * li + 1]                       # (1, out_pad)  compute dtype
        # MXU matmul, f32 accumulation; epilogue in the compute dtype.
        y = jnp.dot(h, w_ref[...], preferred_element_type=jnp.float32)
        y = y.astype(b_ref.dtype) + b_ref[...]
        h = jnp.maximum(y, 0) if li < n_layers - 1 else y
    o_ref[...] = h.astype(o_ref.dtype)


# ----------------------------------------------------------------------------
# Parameter init / prep (done once, outside the hot path)
# ----------------------------------------------------------------------------
def init_mlp_params(key, size):
    """Matches nn.Linear default init: U(-1/sqrt(fan_in), 1/sqrt(fan_in)).

    Returns a list of (w_t, b) with w_t already transposed to (in, out), f32.
    """
    params = []
    for i in range(len(size) - 1):
        fan_in, fan_out = size[i], size[i + 1]
        key, kw, kb = jax.random.split(key, 3)
        bound = 1.0 / jnp.sqrt(float(fan_in))
        w_t = jax.random.uniform(kw, (fan_in, fan_out), jnp.float32, -bound, bound)
        b = jax.random.uniform(kb, (fan_out,), jnp.float32, -bound, bound)
        params.append((w_t, b))
    return params


def prepare_params(params, compute_dtype=jnp.bfloat16):
    """Pad weights/biases to lane-dense shapes, cast to compute dtype.

    The very first layer's contraction dim (true fan_in) is NOT padded; every
    hidden/output dim is padded to a multiple of 128 lanes.
    """
    prepared = []
    for li, (w_t, b) in enumerate(params):
        fan_in, fan_out = w_t.shape
        in_p = fan_in if li == 0 else _round_up(fan_in, LANE)
        out_p = _round_up(fan_out, LANE)
        w_pad = (
            jnp.zeros((in_p, out_p), compute_dtype)
            .at[:fan_in, :fan_out]
            .set(w_t.astype(compute_dtype))
        )
        b_pad = (
            jnp.zeros((1, out_p), compute_dtype)
            .at[:, :fan_out]
            .set(b.astype(compute_dtype))
        )
        prepared.append((w_pad, b_pad))
    return prepared


# ----------------------------------------------------------------------------
# Forward pass (one fused pallas_call)
# ----------------------------------------------------------------------------
def mlp_forward_pallas(prepared, x, size, *, compute_dtype=jnp.bfloat16,
                       block_batch=512):
    size = tuple(size)
    in_dim, out_dim = size[0], size[-1]

    # x.view(-1, size[0]); cast to the compute dtype once, in the wrapper.
    x = x.reshape(-1, in_dim).astype(compute_dtype)
    batch = x.shape[0]

    out_p = _round_up(out_dim, LANE)

    # Sublane granularity: 16 rows for 16-bit dtypes (packed), 8 for f32.
    sub = max(8, 32 // jnp.dtype(compute_dtype).itemsize)

    tm_cap = _round_up(batch, sub)
    if batch >= 2 * sub:
        # Guarantee >= 2 grid steps when there is enough work, so the
        # "parallel" batch axis shards across both TensorCores on v7x.
        tm_cap = min(tm_cap, _round_up(pl.cdiv(batch, 2), sub))
    tm = min(block_batch, tm_cap)

    grid_n = pl.cdiv(batch, tm)
    padded_batch = grid_n * tm                      # no blind round-up beyond grid*tm

    # Contraction dim stays at its true width (full-dim exception to the 128
    # rule); only the batch rows are zero-padded.
    x_p = jnp.zeros((padded_batch, in_dim), compute_dtype).at[:batch].set(x)

    operands = [x_p]
    in_specs = [pl.BlockSpec((tm, in_dim), lambda i: (i, 0))]
    for w_pad, b_pad in prepared:
        operands += [w_pad, b_pad]
        # Grid-invariant -> single-buffered, VMEM-resident across batch tiles.
        in_specs += [
            pl.BlockSpec(w_pad.shape, lambda i: (0, 0), pipeline_mode=pl.Buffered(1)),
            pl.BlockSpec(b_pad.shape, lambda i: (0, 0), pipeline_mode=pl.Buffered(1)),
        ]

    out = pl.pallas_call(
        _fused_mlp_kernel,
        out_shape=jax.ShapeDtypeStruct((padded_batch, out_p), compute_dtype),
        grid=(grid_n,),
        in_specs=in_specs,
        out_specs=pl.BlockSpec((tm, out_p), lambda i: (i, 0)),
        compiler_params=pltpu.CompilerParams(
            dimension_semantics=("parallel",),
        ),
    )(*operands)

    # Slice the padding off and restore module's f32 output outside the kernel.
    return out[:batch, :out_dim].astype(jnp.float32)


# ----------------------------------------------------------------------------
# Pure-JAX reference
# ----------------------------------------------------------------------------
def mlp_reference(params, x, size):
    x = x.reshape(-1, size[0]).astype(jnp.float32)
    n_layers = len(params)
    for idx, (w_t, b) in enumerate(params):
        y = x @ w_t + b
        x = y if idx == n_layers - 1 else jnp.maximum(y, 0.0)
    return x


# TODO(synk): all_hidden_neurons / activation_pattern helpers are not part of
# forward() and are not translated.

if __name__ == "__main__":
    size = [16, 32, 32, 10]
    key = jax.random.PRNGKey(0)
    key, kx = jax.random.split(key)

    # batch=2, 16 input features (forward flattens to (-1, size[0])).
    x = jax.random.normal(kx, (2, 16), jnp.float32)

    params = init_mlp_params(key, size)
    ref = mlp_reference(params, x, size)

    # --- bf16 compute (fast path: bf16 DMA + MXU, f32 accumulation) ---------
    prepared_bf16 = prepare_params(params, compute_dtype=jnp.bfloat16)
    fwd_bf16 = jax.jit(
        functools.partial(
            mlp_forward_pallas, size=tuple(size), compute_dtype=jnp.bfloat16
        )
    )
    out_bf16 = jax.block_until_ready(fwd_bf16(prepared_bf16, x))
    assert out_bf16.shape == (2, size[-1])
    assert jnp.allclose(out_bf16, ref, atol=3e-2, rtol=3e-2)

    # --- f32 compute (exactness check against the f32 reference) ------------
    prepared_f32 = prepare_params(params, compute_dtype=jnp.float32)
    fwd_f32 = jax.jit(
        functools.partial(
            mlp_forward_pallas, size=tuple(size), compute_dtype=jnp.float32
        )
    )
    out_f32 = jax.block_until_ready(fwd_f32(prepared_f32, x))
    assert out_f32.shape == (2, size[-1])
    assert jnp.allclose(out_f32, ref, atol=1e-5, rtol=1e-5)

    print("KERNEL_OK")
</pallas_src>

<mosaic_0001>
module attributes {stable_mosaic.version = 11 : i64} {
  func.func @_fused_mlp_kernel(%arg0: i32, %arg1: memref<16x16xbf16, #tpu.memory_space<vmem>>, %arg2: memref<16x128xbf16, #tpu.memory_space<vmem>>, %arg3: memref<1x128xbf16, #tpu.memory_space<vmem>>, %arg4: memref<128x128xbf16, #tpu.memory_space<vmem>>, %arg5: memref<1x128xbf16, #tpu.memory_space<vmem>>, %arg6: memref<128x128xbf16, #tpu.memory_space<vmem>>, %arg7: memref<1x128xbf16, #tpu.memory_space<vmem>>, %arg8: memref<16x128xbf16, #tpu.memory_space<vmem>>) attributes {dimension_semantics = [#tpu.dimension_semantics<parallel>], iteration_bounds = array<i64: 1>, scalar_prefetch = 0 : i64, scratch_operands = 0 : i64, tpu.core_type = #tpu.core_type<tc>, window_params = [{transform_indices = @transform_0, window_bounds = array<i64: 16, 16>}, {pipeline_mode = #tpu.pipeline_mode<synchronous>, transform_indices = @transform_1, window_bounds = array<i64: 16, 128>}, {pipeline_mode = #tpu.pipeline_mode<synchronous>, transform_indices = @transform_2, window_bounds = array<i64: 1, 128>}, {pipeline_mode = #tpu.pipeline_mode<synchronous>, transform_indices = @transform_3, window_bounds = array<i64: 128, 128>}, {pipeline_mode = #tpu.pipeline_mode<synchronous>, transform_indices = @transform_4, window_bounds = array<i64: 1, 128>}, {pipeline_mode = #tpu.pipeline_mode<synchronous>, transform_indices = @transform_5, window_bounds = array<i64: 128, 128>}, {pipeline_mode = #tpu.pipeline_mode<synchronous>, transform_indices = @transform_6, window_bounds = array<i64: 1, 128>}, {transform_indices = @transform_7, window_bounds = array<i64: 16, 128>}]} {
    %c0 = arith.constant 0 : index
    %c0_0 = arith.constant 0 : index
    %0 = vector.load %arg1[%c0, %c0_0] : memref<16x16xbf16, #tpu.memory_space<vmem>>, vector<16x16xbf16>
    %c0_1 = arith.constant 0 : index
    %c0_2 = arith.constant 0 : index
    %1 = vector.load %arg2[%c0_1, %c0_2] : memref<16x128xbf16, #tpu.memory_space<vmem>>, vector<16x128xbf16>
    %cst = arith.constant dense<0.000000e+00> : vector<16x128xf32>
    %2 = tpu.matmul %0, %1, %cst {dimension_numbers = #tpu.dot_dimension_numbers<[1], [0], [0], [1], [0, 0, 1, 1], [], []>} : vector<16x16xbf16>, vector<16x128xbf16>, vector<16x128xf32> -> vector<16x128xf32>
    %3 = arith.truncf %2 : vector<16x128xf32> to vector<16x128xbf16>
    %c0_3 = arith.constant 0 : index
    %c0_4 = arith.constant 0 : index
    %4 = vector.load %arg3[%c0_3, %c0_4] : memref<1x128xbf16, #tpu.memory_space<vmem>>, vector<1x128xbf16>
    %5 = vector.broadcast %4 : vector<1x128xbf16> to vector<16x128xbf16>
    %6 = arith.addf %3, %5 : vector<16x128xbf16>
    %cst_5 = arith.constant 0.000000e+00 : bf16
    %7 = vector.broadcast %cst_5 : bf16 to vector<16x128xbf16>
    %8 = arith.maximumf %6, %7 : vector<16x128xbf16>
    %c0_6 = arith.constant 0 : index
    %c0_7 = arith.constant 0 : index
    %9 = vector.load %arg4[%c0_6, %c0_7] : memref<128x128xbf16, #tpu.memory_space<vmem>>, vector<128x128xbf16>
    %cst_8 = arith.constant dense<0.000000e+00> : vector<16x128xf32>
    %10 = tpu.matmul %8, %9, %cst_8 {dimension_numbers = #tpu.dot_dimension_numbers<[1], [0], [0], [1], [0, 0, 1, 1], [], []>} : vector<16x128xbf16>, vector<128x128xbf16>, vector<16x128xf32> -> vector<16x128xf32>
    %11 = arith.truncf %10 : vector<16x128xf32> to vector<16x128xbf16>
    %c0_9 = arith.constant 0 : index
    %c0_10 = arith.constant 0 : index
    %12 = vector.load %arg5[%c0_9, %c0_10] : memref<1x128xbf16, #tpu.memory_space<vmem>>, vector<1x128xbf16>
    %13 = vector.broadcast %12 : vector<1x128xbf16> to vector<16x128xbf16>
    %14 = arith.addf %11, %13 : vector<16x128xbf16>
    %cst_11 = arith.constant 0.000000e+00 : bf16
    %15 = vector.broadcast %cst_11 : bf16 to vector<16x128xbf16>
    %16 = arith.maximumf %14, %15 : vector<16x128xbf16>
    %c0_12 = arith.constant 0 : index
    %c0_13 = arith.constant 0 : index
    %17 = vector.load %arg6[%c0_12, %c0_13] : memref<128x128xbf16, #tpu.memory_space<vmem>>, vector<128x128xbf16>
    %cst_14 = arith.constant dense<0.000000e+00> : vector<16x128xf32>
    %18 = tpu.matmul %16, %17, %cst_14 {dimension_numbers = #tpu.dot_dimension_numbers<[1], [0], [0], [1], [0, 0, 1, 1], [], []>} : vector<16x128xbf16>, vector<128x128xbf16>, vector<16x128xf32> -> vector<16x128xf32>
    %19 = arith.truncf %18 : vector<16x128xf32> to vector<16x128xbf16>
    %c0_15 = arith.constant 0 : index
    %c0_16 = arith.constant 0 : index
    %20 = vector.load %arg7[%c0_15, %c0_16] : memref<1x128xbf16, #tpu.memory_space<vmem>>, vector<1x128xbf16>
    %21 = vector.broadcast %20 : vector<1x128xbf16> to vector<16x128xbf16>
    %22 = arith.addf %19, %21 : vector<16x128xbf16>
    %c0_17 = arith.constant 0 : index
    %c0_18 = arith.constant 0 : index
    %23 = vector.load %arg8[%c0_17, %c0_18] : memref<16x128xbf16, #tpu.memory_space<vmem>>, vector<16x128xbf16>
    tpu.vector_store %arg8[%c0_17, %c0_18], %22 {strides = array<i32>} : memref<16x128xbf16, #tpu.memory_space<vmem>>, vector<16x128xbf16>,
    return
  }
  func.func @transform_0(%arg0: i32) -> (i32, i32) {
    %c0_i32 = arith.constant 0 : i32
    %c0_i32_0 = arith.constant 0 : i32
    return %arg0, %c0_i32 : i32, i32
  }
  func.func @transform_1(%arg0: i32) -> (i32, i32) {
    %c0_i32 = arith.constant 0 : i32
    %c0_i32_0 = arith.constant 0 : i32
    %c0_i32_1 = arith.constant 0 : i32
    return %c0_i32, %c0_i32_0 : i32, i32
  }
  func.func @transform_2(%arg0: i32) -> (i32, i32) {
    %c0_i32 = arith.constant 0 : i32
    %c0_i32_0 = arith.constant 0 : i32
    %c0_i32_1 = arith.constant 0 : i32
    return %c0_i32, %c0_i32_0 : i32, i32
  }
  func.func @transform_3(%arg0: i32) -> (i32, i32) {
    %c0_i32 = arith.constant 0 : i32
    %c0_i32_0 = arith.constant 0 : i32
    %c0_i32_1 = arith.constant 0 : i32
    return %c0_i32, %c0_i32_0 : i32, i32
  }
  func.func @transform_4(%arg0: i32) -> (i32, i32) {
    %c0_i32 = arith.constant 0 : i32
    %c0_i32_0 = arith.constant 0 : i32
    %c0_i32_1 = arith.constant 0 : i32
    return %c0_i32, %c0_i32_0 : i32, i32
  }
  func.func @transform_5(%arg0: i32) -> (i32, i32) {
    %c0_i32 = arith.constant 0 : i32
    %c0_i32_0 = arith.constant 0 : i32
    %c0_i32_1 = arith.constant 0 : i32
    return %c0_i32, %c0_i32_0 : i32, i32
  }
  func.func @transform_6(%arg0: i32) -> (i32, i32) {
    %c0_i32 = arith.constant 0 : i32
    %c0_i32_0 = arith.constant 0 : i32
    %c0_i32_1 = arith.constant 0 : i32
    return %c0_i32, %c0_i32_0 : i32, i32
  }
  func.func @transform_7(%arg0: i32) -> (i32, i32) {
    %c0_i32 = arith.constant 0 : i32
    %c0_i32_0 = arith.constant 0 : i32
    return %arg0, %c0_i32 : i32, i32
  }
}

</mosaic_0001>

<bundles_post_ra>
// kernel: mlp_forward_pallas.1
= control target key start
LH: loop header
LB: loop body
LE: loop exit
PB: predicated region body
PF: predicated region fallthrough
CT: control target
= control target key end

     0   :  { %12 = vsyncpa [#allocation3], 0  ;;  %s644_s0 = inlined_call_operand.vmem [shape: bf16[16,16], index: 0, kind: input, shape index: {}]   ;;  %s645_s1 = inlined_call_operand.vmem [shape: bf16[16,128], index: 1, kind: input, shape index: {}]   ;;  %s646_s2 = inlined_call_operand.vmem [shape: bf16[1,128], index: 2, kind: input, shape index: {}]   ;;  %s647_s3 = inlined_call_operand.hbm [shape: bf16[128,128], index: 3, kind: input, shape index: {}]   ;;  %s648_s4 = inlined_call_operand.vmem [shape: bf16[1,128], index: 4, kind: input, shape index: {}]   ;;  %s649_s5 = inlined_call_operand.hbm [shape: bf16[128,128], index: 5, kind: input, shape index: {}]   ;;  %s650_s6 = inlined_call_operand.vmem [shape: bf16[1,128], index: 6, kind: input, shape index: {}]   ;;  %s651_s7 = inlined_call_operand.vmem [shape: bf16[16,128], index: 7, kind: output, shape index: {}]  }
   0x1   :  { %13 = vsyncpa [#allocation5], 0  ;;  %s532_s24 = smov [#allocation2]   ;;  %s484_s28 = scalar_lea.hbm %s647_s3, 1024 }
   0x2   :  { %s25_s25 = sshll.u32 %s532_s24, 4  ;;  %p485_p0 = scmp.ne.s32.totalorder %s647_s3, %s484_s28  ;;  %s26_s25 = int_to_ptr.vmem [resolvable:$true] %s25_s25 }
   0x3   :  { %p488_p1 = scmp.lt.u32.totalorder %s484_s28, %s647_s3 }
   0x5   :  { %p490_p2 = pnand %p488_p1, %p485_p0 }
   0x7   :  { %493 = shalt.err (!%p490_p2)
}
   0x8   :  { %s494_s10 = scalar_lea.vmem %s26_s25, 1024  ;;  %p499_p4 = scmp.lt.s32.totalorder %s26_s25, %s26_s25 }
   0x9   :  { %p495_p3 = scmp.ne.s32.totalorder %s26_s25, %s494_s10  ;;  %p500_p5 = scmp.lt.s32.totalorder %s494_s10, %s494_s10 }
   0xb   :  { %p501_p6 = por %p500_p5, %p499_p4 }
   0xd   :  { %p502_p7 = pnand %p501_p6, %p495_p3 }
   0xf   :  { %505 = shalt.err (!%p502_p7)
}
  0x10   :  { %s533_s11 = smov 64   ;;  %s534_s12 = smov 4  }
  0x11   :  { %31 = dma.hbm_to_vmem [thread:$0]  %s647_s3, 1024, %s26_s25, [#allocation3], %s533_s11, %s533_s11, %s534_s12  }
  0x12   :  { %s535_s15 = smov [#allocation4]   ;;  %s506_s19 = scalar_lea.hbm %s649_s5, 1024 }
  0x13   :  { %s39_s16 = sshll.u32 %s535_s15, 4  ;;  %p507_p8 = scmp.ne.s32.totalorder %s649_s5, %s506_s19  ;;  %s40_s16 = int_to_ptr.vmem [resolvable:$true] %s39_s16 }
  0x14   :  { %p510_p9 = scmp.lt.u32.totalorder %s506_s19, %s649_s5 }
  0x16   :  { %p512_p10 = pnand %p510_p9, %p507_p8 }
  0x18   :  { %515 = shalt.err (!%p512_p10)
}
  0x19   :  { %s516_s24 = scalar_lea.vmem %s40_s16, 1024  ;;  %p521_p12 = scmp.lt.s32.totalorder %s40_s16, %s40_s16 }
  0x1a   :  { %p517_p11 = scmp.ne.s32.totalorder %s40_s16, %s516_s24  ;;  %p522_p13 = scmp.lt.s32.totalorder %s516_s24, %s516_s24 }
  0x1c   :  { %p523_p0 = por %p522_p13, %p521_p12 }
  0x1e   :  { %p524_p1 = pnand %p523_p0, %p517_p11 }
  0x20   :  { %527 = shalt.err (!%p524_p1)
}
  0x21   :  { %45 = dma.hbm_to_vmem [thread:$0]  %s649_s5, 1024, %s40_s16, [#allocation5], %s533_s11, %s533_s11, %s534_s12  }
  0x22   :  { %528 = dma.done.wait [#allocation3], 1024  }
  0x23   :  { %529 = vsyncadd [#allocation3], 4294966272 }
  0x24   :  { %530 = dma.done.wait [#allocation5], 1024  }
  0x25   :  { %531 = vsyncadd [#allocation5], 4294966272  ;;  %v536_v0 = vmov 0.0   ;;  %vm537_vm0 = vmmov 0   ;;  %v466_v1 = vld [vmem:[%s645_s1] sm:$0xff]   ;;  %vm70_vm1 = vcmask 130048   ;;  %v120_v17 = vlaneseq }
  0x26   :  { %413 = vmatprep.subr.bf16.mxu0 %v536_v0  ;;  %415 = vmatprep.mubr.msk.bf16.mxu0 %vm537_vm0, %v536_v0  ;;  %v467_v2 = vld [vmem:[%s644_s0] sm:$0xff]   ;;  %v469_v4 = vld [vmem:[#allocation2 + $0x8] sm:$0xff]   ;;  %v470_v5 = vld [vmem:[#allocation2 + $0x10] sm:$0xff]   ;;  %v538_v29 = vmov 0  }
  0x27   :  { %419 = vmatprep.subr.bf16.mxu1 %v536_v0  ;;  %435 = vmatprep.mubr.msk.bf16.mxu1 %vm537_vm0, %v536_v0  ;;  %v468_v3 = vld [vmem:[#allocation2] sm:$0xff]   ;;  %v471_v6 = vld [vmem:[#allocation2 + $0x18] sm:$0xff]   ;;  %v473_v8 = vld [vmem:[#allocation2 + $0x28] sm:$0xff]   ;;  %v121_v18 = vshrl.u32 %v120_v17, 7 }
  0x28   :  { %414 = vmatpush3.bf16.msra.mxu0 %v466_v1  ;;  %420 = vmatpush3.bf16.msra.mxu1 %v468_v3  ;;  %v472_v7 = vld [vmem:[#allocation2 + $0x20] sm:$0xff]   ;;  %v474_v9 = vld [vmem:[#allocation2 + $0x30] sm:$0xff]   ;;  %v475_v10 = vld [vmem:[#allocation2 + $0x38] sm:$0xff]  }
  0x29   :  { %439 = vmatprep.subr.bf16.mxu0 %v536_v0  ;;  %421 = vmatprep.subr.bf16.mxu1 %v536_v0  ;;  %v476_v11 = vld [vmem:[#allocation4] sm:$0xff]   ;;  %v477_v12 = vld [vmem:[#allocation4 + $0x8] sm:$0xff]   ;;  %v478_v13 = vld [vmem:[#allocation4 + $0x10] sm:$0xff]   ;;  %v122_v21 = vsub.s32 0, %v121_v18 }
  0x2a   :  { %v479_v14 = vld [vmem:[#allocation4 + $0x18] sm:$0xff]   ;;  %v480_v15 = vld [vmem:[#allocation4 + $0x20] sm:$0xff]   ;;  %v481_v16 = vld [vmem:[#allocation4 + $0x28] sm:$0xff]  }
  0x2b   :  { %416 = vmatmul.mubr.msk.bf16.vlgmr.msra.gmra.mrb[0].mxu0 %vm70_vm1, %v467_v2  ;;  %v116_v19 = vld [vmem:[%s646_s2] sm:$0x1]  ;;  %v482_v31 = vld [vmem:[#allocation4 + $0x30] sm:$0xff]   ;;  %v483_v32 = vld [vmem:[#allocation4 + $0x38] sm:$0xff]  }
  0x2c   :  { %455 = vmatprep.mubr.msk.bf16.mxu0 %vm537_vm0, %v536_v0  ;;  %422 = vmatpush3.bf16.msra.mxu1 %v469_v4  ;;  %v118_v20 = vpack.i.b16 %v116_v19, %v116_v19  ;;  %v232_v33 = vld [vmem:[%s648_s4] sm:$0x1] }
  0x2d   :  { %423 = vmatprep.subr.bf16.mxu1 %v536_v0  ;;  %440 = vmatpush3.bf16.msra.mxu0 %v476_v11  ;;  %v234_v34 = vpack.i.b16 %v232_v33, %v232_v33  ;;  %v348_v43 = vld [vmem:[%s650_s6] sm:$0x1] }
  0x2e   :  { %441 = vmatprep.subr.bf16.mxu0 %v536_v0  ;;  %v123_v24 = vrot.slane %v118_v20, %v122_v21  ;;  %v350_v44 = vpack.i.b16 %v348_v43, %v348_v43 }
  0x2f   :  { %v239_v37 = vrot.slane %v234_v34, %v122_v21 }
  0x30   :  { %424 = vmatpush3.bf16.msra.mxu1 %v470_v5  ;;  %v355_v47 = vrot.slane %v350_v44, %v122_v21 }
  0x31   :  { %425 = vmatprep.subr.bf16.mxu1 %v536_v0  ;;  %442 = vmatpush3.bf16.msra.mxu0 %v477_v12 }
  0x32   :  { %443 = vmatprep.subr.bf16.mxu0 %v536_v0 }
  0x34   :  { %426 = vmatpush3.bf16.msra.mxu1 %v471_v6 }
  0x35   :  { %427 = vmatprep.subr.bf16.mxu1 %v536_v0  ;;  %444 = vmatpush3.bf16.msra.mxu0 %v478_v13 }
  0x36   :  { %445 = vmatprep.subr.bf16.mxu0 %v536_v0 }
  0x38   :  { %428 = vmatpush3.bf16.msra.mxu1 %v472_v7 }
  0x39   :  { %429 = vmatprep.subr.bf16.mxu1 %v536_v0  ;;  %446 = vmatpush3.bf16.msra.mxu0 %v479_v14 }
  0x3a   :  { %447 = vmatprep.subr.bf16.mxu0 %v536_v0 }
  0x3c   :  { %430 = vmatpush3.bf16.msra.mxu1 %v473_v8 }
  0x3d   :  { %431 = vmatprep.subr.bf16.mxu1 %v536_v0  ;;  %448 = vmatpush3.bf16.msra.mxu0 %v480_v15 }
  0x3e   :  { %449 = vmatprep.subr.bf16.mxu0 %v536_v0 }
  0x40   :  { %432 = vmatpush3.bf16.msra.mxu1 %v474_v9 }
  0x41   :  { %433 = vmatprep.subr.bf16.mxu1 %v536_v0  ;;  %450 = vmatpush3.bf16.msra.mxu0 %v481_v16 }
  0x42   :  { %451 = vmatprep.subr.bf16.mxu0 %v536_v0 }
  0x44   :  { %434 = vmatpush3.bf16.msra.mxu1 %v475_v10 }
  0x45   :  { %452 = vmatpush3.bf16.msra.mxu0 %v482_v31 }
  0x46   :  { %453 = vmatprep.subr.bf16.mxu0 %v536_v0 }
  0x49   :  { %454 = vmatpush3.bf16.msra.mxu0 %v483_v32 }
  0xfe   :  { %v108_v22 = vpop.f32.mrb[0].mxu0 }
  0xff   :  { %v417_v23 = vpop.f32.mrb[1].mxu0 }
 0x100   :  { %v111_v25 = vpop.f32.mrb[2].mxu0 }
 0x101   :  { %v115_v26 = vpack.c.bf16 %v111_v25, %v108_v22  ;;  %v418_v27 = vpop.f32.mrb[3].mxu0 }
 0x103   :  { %v124_v28 = vadd.bf16 %v123_v24, %v115_v26 }
 0x105   :  { %v125_v30 = vmax.bf16 %v538_v29, %v124_v28 }
 0x107   :  { %436 = vmatmul.mubr.bf16.vlgmr.msra.gmra.mrb[0].mxu1 %v125_v30 }
 0x1da   :  { %v224_v35 = vpop.f32.mrb[0].mxu1 }
 0x1db   :  { %v437_v36 = vpop.f32.mrb[1].mxu1 }
 0x1dc   :  { %v227_v38 = vpop.f32.mrb[2].mxu1 }
 0x1dd   :  { %v231_v39 = vpack.c.bf16 %v227_v38, %v224_v35  ;;  %v438_v40 = vpop.f32.mrb[3].mxu1 }
 0x1df   :  { %v240_v41 = vadd.bf16 %v239_v37, %v231_v39 }
 0x1e1   :  { %v241_v42 = vmax.bf16 %v538_v29, %v240_v41 }
 0x1e3   :  { %456 = vmatmul.mubr.bf16.vlgmr.msra.gmra.mrb[4].mxu0 %v241_v42 }
 0x2b6   :  { %v340_v45 = vpop.f32.mrb[4].mxu0 }
 0x2b7   :  { %v457_v46 = vpop.f32.mrb[5].mxu0 }
 0x2b8   :  { %v343_v48 = vpop.f32.mrb[6].mxu0 }
 0x2b9   :  { %v347_v49 = vpack.c.bf16 %v343_v48, %v340_v45  ;;  %v458_v50 = vpop.f32.mrb[7].mxu0 }
 0x2bb   :  { %v356_v51 = vadd.bf16 %v355_v47, %v347_v49 }
 0x2bd   :  { %v391_v52 = vcombine.low %v356_v51, %v356_v51  ;;  %v392_v53 = vcombine.high %v356_v51, %v356_v51 }
 0x2bf   :  { %364 = vst [vmem:[%s651_s7] sm:$0xf] %v391_v52  ;;  %365 = vst [vmem:[%s651_s7 + $0x4] sm:$0xf] %v392_v53 }
 0x2c0   :  { %370 = vsyncpa [#allocation3], 1 }
 0x2c1   :  { %371 = vsyncpa [#allocation5], 1 }

</bundles_post_ra>
